<compile_context>
chip_gen: v6e
topology: v6e:2x2x1
jax: 0.10.0
libtpu: 0.0.40
codegen_flags: <defaults>
</compile_context>

<pallas_src>
import functools

import jax
import jax.numpy as jnp
from jax.experimental import pallas as pl
from jax.experimental.pallas import tpu as pltpu


def _cdiv(a: int, b: int) -> int:
    return -(-a // b)


def _round_up(a: int, b: int) -> int:
    return _cdiv(a, b) * b


def _vmem_capacity_bytes() -> int:
    """Physical VMEM per TensorCore (generation aware), with a safe fallback."""
    try:
        cap = int(getattr(pltpu.get_tpu_info(), "vmem_capacity_bytes", 0))
        if cap > 0:
            return cap
    except Exception:
        pass
    return 128 << 20  # v5e / v6e


# --------------------------------------------------------------------------- kernels
def _conv1d_kernel(x_ref, w_ref, b_ref, o_ref):
    # Full-K path: x (tm, nx), w (nx, tn), b (1, tn) f32, o (tm, tn).
    acc = jnp.dot(x_ref[...], w_ref[...], preferred_element_type=jnp.float32)
    o_ref[...] = (acc + b_ref[...]).astype(o_ref.dtype)


def _conv1d_kernel_ktiled(x_ref, w_ref, b_ref, o_ref, acc_ref):
    # K-tiled path: x (tm, tk), w (tk, tn), f32 accumulator scratch (tm, tn).
    k = pl.program_id(2)

    @pl.when(k == 0)
    def _():
        acc_ref[...] = jnp.zeros_like(acc_ref)

    acc_ref[...] += jnp.dot(x_ref[...], w_ref[...],
                            preferred_element_type=jnp.float32)

    @pl.when(k == pl.num_programs(2) - 1)
    def _():
        o_ref[...] = (acc_ref[...] + b_ref[...]).astype(o_ref.dtype)


# --------------------------------------------------------------------------- wrapper
@functools.partial(jax.jit,
                   static_argnames=("tm", "tn", "compute_dtype", "out_dtype"))
def conv1d(x, weight, bias, *, tm: int = 512, tn: int = 1024,
           compute_dtype=jnp.bfloat16, out_dtype=None):
    """Pallas implementation of GPT-2 Conv1D forward.

    x: (..., nx), weight: (nx, nf), bias: (nf,) -> (..., nf)
    compute_dtype: operand dtype for the matmul (default bf16, MXU-native on
                   all generations); accumulation is always f32.
    out_dtype:     output dtype (default: x.dtype).
    """
    nx, nf = weight.shape
    lead_shape = x.shape[:-1]
    out_dt = jnp.dtype(out_dtype) if out_dtype is not None else x.dtype

    x2d = x.reshape(-1, nx)
    M = x2d.shape[0]

    op_dt = (jnp.dtype(compute_dtype) if compute_dtype is not None
             else jnp.result_type(x.dtype, weight.dtype))
    if x2d.dtype != op_dt:
        x2d = x2d.astype(op_dt)
    w_op = weight if weight.dtype == op_dt else weight.astype(op_dt)
    bias2d = bias.reshape(1, nf).astype(jnp.float32)

    op_bytes = jnp.dtype(op_dt).itemsize
    out_bytes = jnp.dtype(out_dt).itemsize
    # Sublane granularity for the M dim: 8 for 32-bit, 16 for 16-bit operands.
    sub_m = 8 * max(1, 4 // min(op_bytes, out_bytes))

    # ---- generation-aware VMEM budget for the (double-buffered) tile set ----
    capacity = _vmem_capacity_bytes()
    budget = max(16 << 20, capacity - (26 << 20))  # ~38 MiB on v7x, ~102 MiB on v5e/v6e

    def footprint(tm_, tn_, k_, acc=False):
        f = 2 * (tm_ * k_ * op_bytes + k_ * tn_ * op_bytes + tn_ * 4
                 + tm_ * tn_ * out_bytes)
        if acc:
            f += tm_ * tn_ * 4  # single-buffered f32 accumulator scratch
        return f

    # ---- tile sizing ---------------------------------------------------------
    # M tile: balanced so the trailing (masked) block is not nearly empty.
    tm_req = max(sub_m, (tm // sub_m) * sub_m)
    if M <= sub_m:
        tm_eff = M                                     # full dim (tiny M)
    else:
        tm_eff = _round_up(_cdiv(M, _cdiv(M, tm_req)), sub_m)

    # nf tile: lane-dense multiple of 128 (or the full dim when nf <= 128).
    tn_req = max(128, (tn // 128) * 128)
    if nf <= 128:
        tn_eff, nf_cap = nf, nf
    else:
        tn_eff = _round_up(_cdiv(nf, _cdiv(nf, tn_req)), 128)
        nf_cap = _round_up(nf, 128)

    # Shrink toward MXU-friendly floors if full-K residency overflows the budget.
    TM_FLOOR, TN_FLOOR = 256, 512
    while footprint(tm_eff, tn_eff, nx) > budget:
        if nf > 128 and tn_eff > TN_FLOOR:
            tn_eff = _round_up(tn_eff // 2, 128)
        elif M > sub_m and tm_eff > max(TM_FLOOR, sub_m):
            tm_eff = _round_up(tm_eff // 2, sub_m)
        else:
            break

    use_k_tiling = footprint(tm_eff, tn_eff, nx) > budget

    if not use_k_tiling and nf > 128:
        # Grow tn (up to full nf) while it still fits: cuts x re-streams
        # (traffic = num_n*|x| + |W| + |y|) and grid-step overhead.
        while tn_eff < nf_cap:
            cand = min(nf_cap, _round_up(tn_eff * 2, 128))
            if footprint(tm_eff, cand, nx) > budget:
                break
            tn_eff = cand

    tk = nx
    num_k = 1
    if use_k_tiling:
        # Large nx (mostly v7x's 64 MiB VMEM): keep MXU-friendly tm/tn and tile
        # K with an f32 accumulator instead of shrinking tm/tn further.
        tk = max(128, min(_round_up(nx, 128), 2048))
        while footprint(tm_eff, tn_eff, tk, acc=True) > budget and tk > 128:
            tk = _round_up(tk // 2, 128)
        while footprint(tm_eff, tn_eff, tk, acc=True) > budget:
            if nf > 128 and tn_eff > 128:
                tn_eff = _round_up(tn_eff // 2, 128)
            elif M > sub_m and tm_eff > sub_m:
                tm_eff = _round_up(tm_eff // 2, sub_m)
            else:
                break
        k_pad = _round_up(nx, tk)
        if k_pad != nx:
            # Zero-padding K is semantically exact (zeros contribute nothing);
            # only taken on the rare very-large-nx fallback path.
            x2d = jnp.pad(x2d, ((0, 0), (0, k_pad - nx)))
            w_op = jnp.pad(w_op, ((0, k_pad - nx), (0, 0)))
        num_k = k_pad // tk

    num_m = _cdiv(M, tm_eff)
    num_n = _cdiv(nf, tn_eff)

    # ---- VMEM limit: actual footprint + headroom, capped at physical --------
    vmem_need = footprint(tm_eff, tn_eff, tk if use_k_tiling else nx,
                          acc=use_k_tiling)
    vmem_limit = int(min(max(vmem_need + (4 << 20), 32 << 20), capacity))

    # ---- cost estimate reflecting the real streaming pattern ----------------
    bytes_x = M * nx * op_bytes
    bytes_w = nx * nf * op_bytes
    bytes_y = M * nf * out_bytes
    bytes_b = 4 * nf
    if use_k_tiling:
        bytes_accessed = num_n * bytes_x + num_m * bytes_w + bytes_y + bytes_b
    else:
        bytes_accessed = num_n * bytes_x + bytes_w + bytes_y + bytes_b
    cost = pl.CostEstimate(flops=2 * M * nx * nf, transcendentals=0,
                           bytes_accessed=bytes_accessed)

    # ---- grid / specs --------------------------------------------------------
    if not use_k_tiling:
        grid = (num_n, num_m)
        in_specs = [
            pl.BlockSpec((tm_eff, nx), lambda j, i: (i, 0)),   # x row tile
            pl.BlockSpec((nx, tn_eff), lambda j, i: (0, j)),   # W col tile (resident over i)
            pl.BlockSpec((1, tn_eff), lambda j, i: (0, j)),    # bias slice (f32)
        ]
        out_specs = pl.BlockSpec((tm_eff, tn_eff), lambda j, i: (i, j))
        kernel = _conv1d_kernel
        scratch = []
        # num_m (inner axis) is large -> preferred v7x 2-TC split target.
        dims = ("parallel", "parallel")
    else:
        grid = (num_n, num_m, num_k)                            # K last ("arbitrary")
        in_specs = [
            pl.BlockSpec((tm_eff, tk), lambda j, i, k: (i, k)),
            pl.BlockSpec((tk, tn_eff), lambda j, i, k: (k, j)),
            pl.BlockSpec((1, tn_eff), lambda j, i, k: (0, j)),
        ]
        out_specs = pl.BlockSpec((tm_eff, tn_eff), lambda j, i, k: (i, j))
        kernel = _conv1d_kernel_ktiled
        scratch = [pltpu.VMEM((tm_eff, tn_eff), jnp.float32)]
        dims = ("parallel", "parallel", "arbitrary")

    out = pl.pallas_call(
        kernel,
        out_shape=jax.ShapeDtypeStruct((M, nf), out_dt),
        grid_spec=pltpu.PrefetchScalarGridSpec(
            num_scalar_prefetch=0,
            grid=grid,
            in_specs=in_specs,
            out_specs=out_specs,
            scratch_shapes=scratch,
        ),
        compiler_params=pltpu.CompilerParams(
            dimension_semantics=dims,
            vmem_limit_bytes=vmem_limit,
        ),
        cost_estimate=cost,
    )(x2d, w_op, bias2d)

    return out.reshape(*lead_shape, nf)


if __name__ == "__main__":
    # Module config: nx = input feature dim, nf = output feature dim.
    batch, seq, nx, nf = 2, 8, 32, 32

    key = jax.random.PRNGKey(0)
    kx, kw, kx2, kw2, kb2 = jax.random.split(key, 5)

    # Deterministic init matching nn.init.normal_(w, std=0.02), bias = zeros.
    weight = 0.02 * jax.random.normal(kw, (nx, nf), dtype=jnp.float32)
    bias = jnp.zeros((nf,), dtype=jnp.float32)
    x = jax.random.normal(kx, (batch, seq, nx), dtype=jnp.float32)

    # Reference (plain JAX) — same semantics as torch.addmm on flattened x.
    y_ref = (x.reshape(-1, nx) @ weight + bias).reshape(batch, seq, nf)

    # f32 opt-in path: tight check.
    y32 = jax.block_until_ready(conv1d(x, weight, bias, compute_dtype=jnp.float32))
    assert y32.shape == (batch, seq, nf)
    assert jnp.allclose(y32, y_ref, atol=1e-5, rtol=1e-5)

    # Default bf16-operand path (f32 accumulation): looser tolerance.
    y = jax.block_until_ready(conv1d(x, weight, bias))
    assert y.shape == (batch, seq, nf)
    assert y.dtype == x.dtype
    assert jnp.allclose(y, y_ref, atol=2e-2, rtol=2e-2)

    # bf16 output knob.
    ybf = jax.block_until_ready(conv1d(x, weight, bias, out_dtype=jnp.bfloat16))
    assert ybf.dtype == jnp.bfloat16
    assert jnp.allclose(ybf.astype(jnp.float32), y_ref, atol=3e-2, rtol=3e-2)

    # Ragged M (non-multiple of the tile) + 128-multiple nf: exercises the
    # pad-free masked trailing blocks (no wrapper jnp.pad of x; output written
    # straight into (M, nf)).
    b2, s2, nx2, nf2 = 2, 75, 96, 256
    w2 = 0.02 * jax.random.normal(kw2, (nx2, nf2), dtype=jnp.float32)
    bias2 = 0.01 * jax.random.normal(kb2, (nf2,), dtype=jnp.float32)
    x2 = jax.random.normal(kx2, (b2, s2, nx2), dtype=jnp.float32)
    y2_ref = (x2.reshape(-1, nx2) @ w2 + bias2).reshape(b2, s2, nf2)
    y2 = jax.block_until_ready(conv1d(x2, w2, bias2))
    assert y2.shape == (b2, s2, nf2)
    assert jnp.allclose(y2, y2_ref, atol=3e-2, rtol=3e-2)

    print("KERNEL_OK")
</pallas_src>

<mosaic_0001>
module attributes {stable_mosaic.version = 11 : i64} {
  func.func @_conv1d_kernel(%arg0: i32, %arg1: i32, %arg2: memref<16x32xf32, #tpu.memory_space<vmem>>, %arg3: memref<32x32xf32, #tpu.memory_space<vmem>>, %arg4: memref<1x32xf32, #tpu.memory_space<vmem>>, %arg5: memref<16x32xf32, #tpu.memory_space<vmem>>) attributes {dimension_semantics = [#tpu.dimension_semantics<parallel>, #tpu.dimension_semantics<parallel>], iteration_bounds = array<i64: 1, 1>, scalar_prefetch = 0 : i64, scratch_operands = 0 : i64, tpu.core_type = #tpu.core_type<tc>, window_params = [{transform_indices = @transform_0, window_bounds = array<i64: 16, 32>}, {transform_indices = @transform_1, window_bounds = array<i64: 32, 32>}, {transform_indices = @transform_2, window_bounds = array<i64: 1, 32>}, {transform_indices = @transform_3, window_bounds = array<i64: 16, 32>}]} {
    %c0 = arith.constant 0 : index
    %c0_0 = arith.constant 0 : index
    %0 = vector.load %arg2[%c0, %c0_0] : memref<16x32xf32, #tpu.memory_space<vmem>>, vector<16x32xf32>
    %c0_1 = arith.constant 0 : index
    %c0_2 = arith.constant 0 : index
    %1 = vector.load %arg3[%c0_1, %c0_2] : memref<32x32xf32, #tpu.memory_space<vmem>>, vector<32x32xf32>
    %cst = arith.constant dense<0.000000e+00> : vector<16x32xf32>
    %2 = tpu.matmul %0, %1, %cst {dimension_numbers = #tpu.dot_dimension_numbers<[1], [0], [0], [1], [0, 0, 1, 1], [], []>} : vector<16x32xf32>, vector<32x32xf32>, vector<16x32xf32> -> vector<16x32xf32>
    %c0_3 = arith.constant 0 : index
    %c0_4 = arith.constant 0 : index
    %3 = vector.load %arg4[%c0_3, %c0_4] : memref<1x32xf32, #tpu.memory_space<vmem>>, vector<1x32xf32>
    %4 = vector.broadcast %3 : vector<1x32xf32> to vector<16x32xf32>
    %5 = arith.addf %2, %4 : vector<16x32xf32>
    %c0_5 = arith.constant 0 : index
    %c0_6 = arith.constant 0 : index
    %6 = vector.load %arg5[%c0_5, %c0_6] : memref<16x32xf32, #tpu.memory_space<vmem>>, vector<16x32xf32>
    tpu.vector_store %arg5[%c0_5, %c0_6], %5 {strides = array<i32>} : memref<16x32xf32, #tpu.memory_space<vmem>>, vector<16x32xf32>,
    return
  }
  func.func @transform_0(%arg0: i32, %arg1: i32) -> (i32, i32) {
    %c0_i32 = arith.constant 0 : i32
    %c0_i32_0 = arith.constant 0 : i32
    return %arg1, %c0_i32 : i32, i32
  }
  func.func @transform_1(%arg0: i32, %arg1: i32) -> (i32, i32) {
    %c0_i32 = arith.constant 0 : i32
    %c0_i32_0 = arith.constant 0 : i32
    return %c0_i32, %arg0 : i32, i32
  }
  func.func @transform_2(%arg0: i32, %arg1: i32) -> (i32, i32) {
    %c0_i32 = arith.constant 0 : i32
    %c0_i32_0 = arith.constant 0 : i32
    return %c0_i32, %arg0 : i32, i32
  }
  func.func @transform_3(%arg0: i32, %arg1: i32) -> (i32, i32) {
    %c0_i32 = arith.constant 0 : i32
    return %arg1, %arg0 : i32, i32
  }
}

</mosaic_0001>

<bundles_post_ra>
// kernel: conv1d.1
= control target key start
LH: loop header
LB: loop body
LE: loop exit
PB: predicated region body
PF: predicated region fallthrough
CT: control target
= control target key end

     0   :  { %8 = vsyncpa [#allocation3], 0  ;;  %s299_s0 = inlined_call_operand.hbm [shape: f32[16,32], index: 0, kind: input, shape index: {}]   ;;  %s300_s1 = inlined_call_operand.hbm [shape: f32[32,32], index: 1, kind: input, shape index: {}]   ;;  %s301_s2 = inlined_call_operand.vmem [shape: f32[1,32], index: 2, kind: input, shape index: {}]   ;;  %s302_s3 = inlined_call_operand.hbm [shape: f32[16,32], index: 3, kind: output, shape index: {}]  }
   0x1   :  { %9 = vsyncpa [#allocation6], 0 }
   0x2   :  { %10 = vsyncpa [#allocation4], 0  ;;  %s249_s12 = smov [#allocation2]  }
   0x3   :  { %s16_s13 = sshll.u32 %s249_s12, 4  ;;  %s17_s13 = int_to_ptr.vmem [resolvable:$true] %s16_s13 }
   0x4   :  { %s191_s14 = scalar_lea.vmem %s17_s13, 256  ;;  %p196_p1 = scmp.lt.s32.totalorder %s17_s13, %s17_s13 }
   0x5   :  { %p192_p0 = scmp.ne.s32.totalorder %s17_s13, %s191_s14  ;;  %p197_p2 = scmp.lt.s32.totalorder %s191_s14, %s191_s14 }
   0x7   :  { %p198_p3 = por %p197_p2, %p196_p1 }
   0x9   :  { %p199_p4 = pnand %p198_p3, %p192_p0 }
   0xb   :  { %202 = shalt.err (!%p199_p4)
}
   0xc   :  { %s250_s15 = smov 128   ;;  %s251_s16 = smov 8  }
   0xd   :  { %22 = dma.hbm_to_vmem [thread:$0]  %s299_s0, 256, %s17_s13, [#allocation3], %s250_s15, %s250_s15, %s251_s16  }
   0xe   :  { %s252_s19 = smov [#allocation5]  }
   0xf   :  { %s28_s20 = sshll.u32 %s252_s19, 4  ;;  %s29_s20 = int_to_ptr.vmem [resolvable:$true] %s28_s20 }
  0x10   :  { %s211_s21 = scalar_lea.vmem %s29_s20, 512  ;;  %p216_p6 = scmp.lt.s32.totalorder %s29_s20, %s29_s20 }
  0x11   :  { %p212_p5 = scmp.ne.s32.totalorder %s29_s20, %s211_s21  ;;  %p217_p7 = scmp.lt.s32.totalorder %s211_s21, %s211_s21 }
  0x13   :  { %p218_p8 = por %p217_p7, %p216_p6 }
  0x15   :  { %p219_p9 = pnand %p218_p8, %p212_p5 }
  0x17   :  { %222 = shalt.err (!%p219_p9)
}
  0x18   :  { %34 = dma.hbm_to_vmem [thread:$0]  %s300_s1, 512, %s29_s20, [#allocation6], %s250_s15, %s250_s15, %s251_s16  }
  0x19   :  { %243 = dma.done.wait [#allocation3], 256  }
  0x1a   :  { %244 = vsyncadd [#allocation3], 4294967040 }
  0x1b   :  { %245 = dma.done.wait [#allocation6], 512  }
  0x1c   :  { %246 = vsyncadd [#allocation6], 4294966784  ;;  %vm56_vm0 = vcmask 261120   ;;  %v48_v0 = vld [vmem:[#allocation5 + $0x18] sm:$0xff]  ;;  %v47_v1 = vld [vmem:[#allocation5 + $0x10] sm:$0xff]  ;;  %s253_s24 = smov [#allocation7]  }
  0x1d   :  { %167 = vmatprep.subr.mxu0 %v48_v0  ;;  %v43_v2 = vld [vmem:[#allocation2] sm:$0xff]  ;;  %v46_v3 = vld [vmem:[#allocation5 + $0x8] sm:$0xff]  ;;  %v45_v4 = vld [vmem:[#allocation5] sm:$0xff]  ;;  %s145_s25 = sshll.u32 %s253_s24, 4  ;;  %s146_s25 = int_to_ptr.vmem [resolvable:$true] %s145_s25 }
  0x1e   :  { %168 = vmatpush3.msra.mxu0 %v48_v0  ;;  %175 = vmatprep.mubr.msk.f32.mxu0 %vm56_vm0, %v43_v2  ;;  %v44_v5 = vld [vmem:[#allocation2 + $0x8] sm:$0xff]  ;;  %v158_v6 = vld [vmem:[%s301_s2] ss:$0 sm:$0xff]  ;;  %s223_s26 = scalar_lea.vmem %s146_s25, 256  ;;  %p228_p11 = scmp.lt.s32.totalorder %s146_s25, %s146_s25 }
  0x1f   :  { %169 = vmatprep.subr.mxu0 %v47_v1  ;;  %p224_p10 = scmp.ne.s32.totalorder %s146_s25, %s223_s26  ;;  %p229_p12 = scmp.lt.s32.totalorder %s223_s26, %s223_s26 }
  0x20   :  { %170 = vmatpush3.msra.mxu0 %v47_v1 }
  0x21   :  { %171 = vmatprep.subr.mxu0 %v46_v3  ;;  %p230_p13 = por %p229_p12, %p228_p11 }
  0x22   :  { %172 = vmatpush3.msra.mxu0 %v46_v3 }
  0x23   :  { %173 = vmatprep.subr.mxu0 %v45_v4  ;;  %p231_p0 = pnand %p230_p13, %p224_p10 }
  0x24   :  { %174 = vmatpush3.msra.mxu0 %v45_v4 }
  0x25   :  { %176 = vmatmul.mubr.msk.f32.vlgmr.msra.gmra.mxu0 %vm56_vm0, %v44_v5 }
  0xe5   :  { %v177_v7 = vpop.f32.mrf.mxu0 }
  0xe6   :  { %v135_v8 = vadd.f32 %v177_v7, %v158_v6 }
  0xe7   :  { %v129_v9 = vpop.f32.mrf.mxu0 }
  0xe8   :  { %139 = vst.msk [vmem:[#allocation7 + $0x8] sm:$0xff] %vm56_vm0, %v135_v8  ;;  %v130_v10 = vadd.f32 %v158_v6, %v129_v9 }
  0xea   :  { %138 = vst.msk [vmem:[#allocation7] sm:$0xff] %vm56_vm0, %v130_v10 }
  0xeb   :  { %234 = shalt.err (!%p231_p0)
}
  0xec   :  { %151 = dma.vmem_to_hbm [thread:$0]  %s146_s25, 256, %s302_s3, [#allocation4], %s250_s15, %s250_s15, %s251_s16  }
  0xed   :  { %247 = dma.done.wait [#allocation4], 256  }
  0xee   :  { %248 = vsyncadd [#allocation4], 4294967040 }
  0xef   :  { %155 = vsyncpa [#allocation3], 1 }
  0xf0   :  { %156 = vsyncpa [#allocation6], 1 }
  0xf1   :  { %157 = vsyncpa [#allocation4], 1 }

</bundles_post_ra>
